<compile_context>
chip_gen: v5e
topology: v5e:2x2
jax: 0.10.0
libtpu: 0.0.40
codegen_flags: <defaults>
</compile_context>

<pallas_src>
import math

import jax
import jax.numpy as jnp
from jax.experimental import pallas as pl
from jax.experimental.pallas import tpu as pltpu


_HIDDEN_DIMS = (36, 72, 144, 72, 36)
_LEAKY_SLOPE = 0.01          # PyTorch nn.LeakyReLU default
_BN_EPS = 1e-5               # PyTorch nn.BatchNorm1d default


def _mlp_kernel(
    xT_ref,
    w1_ref, b1_ref,
    w2_ref, b2_ref,
    w3_ref, b3_ref,
    w4_ref, b4_ref,
    w5_ref, b5_ref,
    wo_ref,
    oT_ref,
):
    def block(h, w_ref, b_ref):
        # Linear (bias=False; BN eval scale folded into weight rows) on the
        # MXU: bf16 x bf16 -> f32 accumulate.  (out,in) @ (in,TM) -> (out,TM).
        h = jnp.dot(w_ref[...], h, preferred_element_type=jnp.float32)
        # BatchNorm1d (eval) shift, f32, broadcast along the lane (batch) axis.
        h = h + b_ref[...]
        # LeakyReLU (slope 0.01) as a single vmax; Dropout = identity (eval).
        h = jnp.maximum(h, _LEAKY_SLOPE * h)
        # Next matmul consumes bf16.
        return h.astype(jnp.bfloat16)

    # f32 tile -> bf16 inside the kernel (VPU slot has slack; avoids an extra
    # wrapper-side HBM pass over x).
    h = xT_ref[...].astype(jnp.bfloat16)          # (F, TM)
    h = block(h, w1_ref, b1_ref)
    h = block(h, w2_ref, b2_ref)
    h = block(h, w3_ref, b3_ref)
    h = block(h, w4_ref, b4_ref)
    h = block(h, w5_ref, b5_ref)
    # Output layer + sigmoid (EUP).
    logits = jnp.dot(wo_ref[...], h, preferred_element_type=jnp.float32)  # (C, TM)
    oT_ref[...] = jax.nn.sigmoid(logits)


def _resident_spec(shape):
    # Whole-array block, constant index map -> stays VMEM-resident across the
    # batch grid (no re-DMA per tile).
    return pl.BlockSpec(shape, lambda i: (0,) * len(shape))


def _pick_batch_tile(n, tm):
    """Batch tile on the lane axis: multiple of 128, >=2 grid steps when possible."""
    if n <= 128:
        return n                      # single full-extent tile (allowed by spec)
    # Cap so the batch grid has at least 2 steps (both v7x TensorCores get work).
    half = -(-n // 2)
    half = ((half + 127) // 128) * 128
    tm = min(tm, half)
    tm = max(128, (tm // 128) * 128)  # keep lane dim a multiple of 128
    return tm


def multiclass_classification_forward(x, prepped, tm=4096):
    """x: (N, num_feature) f32 (native dtype).  prepped: prepare_params() output.

    Returns (N, num_class) f32 probabilities (eval-mode semantics)."""
    n, f = x.shape
    num_class = prepped["w_out"].shape[0]
    tm = _pick_batch_tile(n, tm)
    grid = (pl.cdiv(n, tm),)

    # Lane-dense orientation: batch on the lane axis, features/classes on
    # sublanes.  The transpose is wrapper-side layout plumbing; x stays f32.
    xT = x.T                                               # (F, N)

    flat_inputs = [xT]
    in_specs = [pl.BlockSpec((f, tm), lambda i: (0, i))]
    for li in range(1, 6):
        for key in (f"w{li}", f"b{li}"):
            arr = prepped[key]
            flat_inputs.append(arr)
            in_specs.append(_resident_spec(arr.shape))
    flat_inputs.append(prepped["w_out"])
    in_specs.append(_resident_spec(prepped["w_out"].shape))

    outT = pl.pallas_call(
        _mlp_kernel,
        out_shape=jax.ShapeDtypeStruct((num_class, n), jnp.float32),
        grid=grid,
        in_specs=in_specs,
        out_specs=pl.BlockSpec((num_class, tm), lambda i: (0, i)),
        compiler_params=pltpu.CompilerParams(
            dimension_semantics=("parallel",),
            vmem_limit_bytes=48 * 1024 * 1024,
        ),
    )(*flat_inputs)
    return outT.T                                          # (N, C)


def init_params(key, num_feature, num_class, eps=_BN_EPS):
    """Parameter init mirroring PyTorch defaults (eval-mode BN stats).

    Weights stored in PyTorch's native (out_features, in_features) layout."""
    dims = [num_feature, *_HIDDEN_DIMS, num_class]
    params = {}
    keys = jax.random.split(key, 6)

    def linear_w(k, fan_in, fan_out):
        # nn.Linear default: U(-1/sqrt(fan_in), 1/sqrt(fan_in)).
        bound = 1.0 / math.sqrt(fan_in)
        return jax.random.uniform(
            k, (fan_out, fan_in), jnp.float32, minval=-bound, maxval=bound
        )

    for li in range(1, 6):
        fan_in, fan_out = dims[li - 1], dims[li]
        params[f"w{li}"] = linear_w(keys[li - 1], fan_in, fan_out)
        # BatchNorm1d defaults: gamma=1, beta=0, running_mean=0, running_var=1.
        gamma = jnp.ones((fan_out,), jnp.float32)
        beta = jnp.zeros((fan_out,), jnp.float32)
        running_mean = jnp.zeros((fan_out,), jnp.float32)
        running_var = jnp.ones((fan_out,), jnp.float32)
        scale = gamma / jnp.sqrt(running_var + eps)
        shift = beta - running_mean * scale
        params[f"scale{li}"] = scale
        params[f"shift{li}"] = shift

    params["w_out"] = linear_w(keys[5], dims[5], dims[6])
    return params


def prepare_params(params):
    """Fold BN (eval) scale into weight rows; bf16 weights, f32 shifts (out,1)."""
    prepped = {}
    for li in range(1, 6):
        w = params[f"w{li}"]                                   # (out, in)
        w_folded = w * params[f"scale{li}"][:, None]           # per-output-row scale
        prepped[f"w{li}"] = w_folded.astype(jnp.bfloat16)
        prepped[f"b{li}"] = params[f"shift{li}"].astype(jnp.float32)[:, None]  # (out,1)
    prepped["w_out"] = params["w_out"].astype(jnp.bfloat16)
    return prepped


def reference_forward(x, prepped):
    """Plain-JAX reference with matched precision (bf16 matmul operands, f32
    accumulation/elementwise) — same math as the eval-mode module up to bf16
    quantization of the folded weights/activations."""
    h = x.astype(jnp.bfloat16)                                 # (N, F)
    for li in range(1, 6):
        h = jnp.dot(h, prepped[f"w{li}"].T, preferred_element_type=jnp.float32)
        h = h + prepped[f"b{li}"][:, 0]
        h = jnp.maximum(h, _LEAKY_SLOPE * h)
        h = h.astype(jnp.bfloat16)
    logits = jnp.dot(h, prepped["w_out"].T, preferred_element_type=jnp.float32)
    return jax.nn.sigmoid(logits)


if __name__ == "__main__":
    num_feature = 32
    num_class = 4
    batch = 8

    key = jax.random.PRNGKey(0)
    k_x, k_p = jax.random.split(key)
    x = jax.random.normal(k_x, (batch, num_feature), jnp.float32)
    params = init_params(k_p, num_feature, num_class)
    prepped = prepare_params(params)

    out = multiclass_classification_forward(x, prepped)
    out = jax.block_until_ready(out)

    ref = reference_forward(x, prepped)
    assert out.shape == (batch, num_class)
    max_diff = jnp.max(jnp.abs(out - ref))
    assert jnp.allclose(out, ref, atol=2e-4, rtol=2e-4), (
        f"max abs diff {max_diff}"
    )
    print("KERNEL_OK")
</pallas_src>

<mosaic_0001>
module attributes {stable_mosaic.version = 11 : i64} {
  func.func @_mlp_kernel(%arg0: i32, %arg1: memref<32x8xf32, #tpu.memory_space<vmem>>, %arg2: memref<36x32xbf16, #tpu.memory_space<vmem>>, %arg3: memref<36x1xf32, #tpu.memory_space<vmem>>, %arg4: memref<72x36xbf16, #tpu.memory_space<vmem>>, %arg5: memref<72x1xf32, #tpu.memory_space<vmem>>, %arg6: memref<144x72xbf16, #tpu.memory_space<vmem>>, %arg7: memref<144x1xf32, #tpu.memory_space<vmem>>, %arg8: memref<72x144xbf16, #tpu.memory_space<vmem>>, %arg9: memref<72x1xf32, #tpu.memory_space<vmem>>, %arg10: memref<36x72xbf16, #tpu.memory_space<vmem>>, %arg11: memref<36x1xf32, #tpu.memory_space<vmem>>, %arg12: memref<4x36xbf16, #tpu.memory_space<vmem>>, %arg13: memref<4x8xf32, #tpu.memory_space<vmem>>) attributes {dimension_semantics = [#tpu.dimension_semantics<parallel>], iteration_bounds = array<i64: 1>, scalar_prefetch = 0 : i64, scratch_operands = 0 : i64, tpu.core_type = #tpu.core_type<tc>, window_params = [{transform_indices = @transform_0, window_bounds = array<i64: 32, 8>}, {pipeline_mode = #tpu.pipeline_mode<synchronous>, transform_indices = @transform_1, window_bounds = array<i64: 36, 32>}, {pipeline_mode = #tpu.pipeline_mode<synchronous>, transform_indices = @transform_2, window_bounds = array<i64: 36, 1>}, {pipeline_mode = #tpu.pipeline_mode<synchronous>, transform_indices = @transform_3, window_bounds = array<i64: 72, 36>}, {pipeline_mode = #tpu.pipeline_mode<synchronous>, transform_indices = @transform_4, window_bounds = array<i64: 72, 1>}, {pipeline_mode = #tpu.pipeline_mode<synchronous>, transform_indices = @transform_5, window_bounds = array<i64: 144, 72>}, {pipeline_mode = #tpu.pipeline_mode<synchronous>, transform_indices = @transform_6, window_bounds = array<i64: 144, 1>}, {pipeline_mode = #tpu.pipeline_mode<synchronous>, transform_indices = @transform_7, window_bounds = array<i64: 72, 144>}, {pipeline_mode = #tpu.pipeline_mode<synchronous>, transform_indices = @transform_8, window_bounds = array<i64: 72, 1>}, {pipeline_mode = #tpu.pipeline_mode<synchronous>, transform_indices = @transform_9, window_bounds = array<i64: 36, 72>}, {pipeline_mode = #tpu.pipeline_mode<synchronous>, transform_indices = @transform_10, window_bounds = array<i64: 36, 1>}, {pipeline_mode = #tpu.pipeline_mode<synchronous>, transform_indices = @transform_11, window_bounds = array<i64: 4, 36>}, {transform_indices = @transform_12, window_bounds = array<i64: 4, 8>}]} {
    %c0 = arith.constant 0 : index
    %c0_0 = arith.constant 0 : index
    %0 = vector.load %arg1[%c0, %c0_0] : memref<32x8xf32, #tpu.memory_space<vmem>>, vector<32x8xf32>
    %1 = arith.truncf %0 : vector<32x8xf32> to vector<32x8xbf16>
    %c0_1 = arith.constant 0 : index
    %c0_2 = arith.constant 0 : index
    %2 = vector.load %arg2[%c0_1, %c0_2] : memref<36x32xbf16, #tpu.memory_space<vmem>>, vector<36x32xbf16>
    %cst = arith.constant dense<0.000000e+00> : vector<36x8xf32>
    %3 = tpu.matmul %2, %1, %cst {dimension_numbers = #tpu.dot_dimension_numbers<[1], [0], [0], [1], [0, 0, 1, 1], [], []>} : vector<36x32xbf16>, vector<32x8xbf16>, vector<36x8xf32> -> vector<36x8xf32>
    %c0_3 = arith.constant 0 : index
    %c0_4 = arith.constant 0 : index
    %4 = vector.load %arg3[%c0_3, %c0_4] : memref<36x1xf32, #tpu.memory_space<vmem>>, vector<36x1xf32>
    %5 = vector.broadcast %4 : vector<36x1xf32> to vector<36x8xf32>
    %6 = arith.addf %3, %5 : vector<36x8xf32>
    %cst_5 = arith.constant 0.00999999977 : f32
    %7 = vector.broadcast %cst_5 : f32 to vector<36x8xf32>
    %8 = arith.mulf %7, %6 : vector<36x8xf32>
    %9 = arith.maximumf %6, %8 : vector<36x8xf32>
    %10 = arith.truncf %9 : vector<36x8xf32> to vector<36x8xbf16>
    %c0_6 = arith.constant 0 : index
    %c0_7 = arith.constant 0 : index
    %11 = vector.load %arg4[%c0_6, %c0_7] : memref<72x36xbf16, #tpu.memory_space<vmem>>, vector<72x36xbf16>
    %cst_8 = arith.constant dense<0.000000e+00> : vector<72x8xf32>
    %12 = tpu.matmul %11, %10, %cst_8 {dimension_numbers = #tpu.dot_dimension_numbers<[1], [0], [0], [1], [0, 0, 1, 1], [], []>} : vector<72x36xbf16>, vector<36x8xbf16>, vector<72x8xf32> -> vector<72x8xf32>
    %c0_9 = arith.constant 0 : index
    %c0_10 = arith.constant 0 : index
    %13 = vector.load %arg5[%c0_9, %c0_10] : memref<72x1xf32, #tpu.memory_space<vmem>>, vector<72x1xf32>
    %14 = vector.broadcast %13 : vector<72x1xf32> to vector<72x8xf32>
    %15 = arith.addf %12, %14 : vector<72x8xf32>
    %cst_11 = arith.constant 0.00999999977 : f32
    %16 = vector.broadcast %cst_11 : f32 to vector<72x8xf32>
    %17 = arith.mulf %16, %15 : vector<72x8xf32>
    %18 = arith.maximumf %15, %17 : vector<72x8xf32>
    %19 = arith.truncf %18 : vector<72x8xf32> to vector<72x8xbf16>
    %c0_12 = arith.constant 0 : index
    %c0_13 = arith.constant 0 : index
    %20 = vector.load %arg6[%c0_12, %c0_13] : memref<144x72xbf16, #tpu.memory_space<vmem>>, vector<144x72xbf16>
    %cst_14 = arith.constant dense<0.000000e+00> : vector<144x8xf32>
    %21 = tpu.matmul %20, %19, %cst_14 {dimension_numbers = #tpu.dot_dimension_numbers<[1], [0], [0], [1], [0, 0, 1, 1], [], []>} : vector<144x72xbf16>, vector<72x8xbf16>, vector<144x8xf32> -> vector<144x8xf32>
    %c0_15 = arith.constant 0 : index
    %c0_16 = arith.constant 0 : index
    %22 = vector.load %arg7[%c0_15, %c0_16] : memref<144x1xf32, #tpu.memory_space<vmem>>, vector<144x1xf32>
    %23 = vector.broadcast %22 : vector<144x1xf32> to vector<144x8xf32>
    %24 = arith.addf %21, %23 : vector<144x8xf32>
    %cst_17 = arith.constant 0.00999999977 : f32
    %25 = vector.broadcast %cst_17 : f32 to vector<144x8xf32>
    %26 = arith.mulf %25, %24 : vector<144x8xf32>
    %27 = arith.maximumf %24, %26 : vector<144x8xf32>
    %28 = arith.truncf %27 : vector<144x8xf32> to vector<144x8xbf16>
    %c0_18 = arith.constant 0 : index
    %c0_19 = arith.constant 0 : index
    %29 = vector.load %arg8[%c0_18, %c0_19] : memref<72x144xbf16, #tpu.memory_space<vmem>>, vector<72x144xbf16>
    %cst_20 = arith.constant dense<0.000000e+00> : vector<72x8xf32>
    %30 = tpu.matmul %29, %28, %cst_20 {dimension_numbers = #tpu.dot_dimension_numbers<[1], [0], [0], [1], [0, 0, 1, 1], [], []>} : vector<72x144xbf16>, vector<144x8xbf16>, vector<72x8xf32> -> vector<72x8xf32>
    %c0_21 = arith.constant 0 : index
    %c0_22 = arith.constant 0 : index
    %31 = vector.load %arg9[%c0_21, %c0_22] : memref<72x1xf32, #tpu.memory_space<vmem>>, vector<72x1xf32>
    %32 = vector.broadcast %31 : vector<72x1xf32> to vector<72x8xf32>
    %33 = arith.addf %30, %32 : vector<72x8xf32>
    %cst_23 = arith.constant 0.00999999977 : f32
    %34 = vector.broadcast %cst_23 : f32 to vector<72x8xf32>
    %35 = arith.mulf %34, %33 : vector<72x8xf32>
    %36 = arith.maximumf %33, %35 : vector<72x8xf32>
    %37 = arith.truncf %36 : vector<72x8xf32> to vector<72x8xbf16>
    %c0_24 = arith.constant 0 : index
    %c0_25 = arith.constant 0 : index
    %38 = vector.load %arg10[%c0_24, %c0_25] : memref<36x72xbf16, #tpu.memory_space<vmem>>, vector<36x72xbf16>
    %cst_26 = arith.constant dense<0.000000e+00> : vector<36x8xf32>
    %39 = tpu.matmul %38, %37, %cst_26 {dimension_numbers = #tpu.dot_dimension_numbers<[1], [0], [0], [1], [0, 0, 1, 1], [], []>} : vector<36x72xbf16>, vector<72x8xbf16>, vector<36x8xf32> -> vector<36x8xf32>
    %c0_27 = arith.constant 0 : index
    %c0_28 = arith.constant 0 : index
    %40 = vector.load %arg11[%c0_27, %c0_28] : memref<36x1xf32, #tpu.memory_space<vmem>>, vector<36x1xf32>
    %41 = vector.broadcast %40 : vector<36x1xf32> to vector<36x8xf32>
    %42 = arith.addf %39, %41 : vector<36x8xf32>
    %cst_29 = arith.constant 0.00999999977 : f32
    %43 = vector.broadcast %cst_29 : f32 to vector<36x8xf32>
    %44 = arith.mulf %43, %42 : vector<36x8xf32>
    %45 = arith.maximumf %42, %44 : vector<36x8xf32>
    %46 = arith.truncf %45 : vector<36x8xf32> to vector<36x8xbf16>
    %c0_30 = arith.constant 0 : index
    %c0_31 = arith.constant 0 : index
    %47 = vector.load %arg12[%c0_30, %c0_31] : memref<4x36xbf16, #tpu.memory_space<vmem>>, vector<4x36xbf16>
    %cst_32 = arith.constant dense<0.000000e+00> : vector<4x8xf32>
    %48 = tpu.matmul %47, %46, %cst_32 {dimension_numbers = #tpu.dot_dimension_numbers<[1], [0], [0], [1], [0, 0, 1, 1], [], []>} : vector<4x36xbf16>, vector<36x8xbf16>, vector<4x8xf32> -> vector<4x8xf32>
    %49 = arith.negf %48 : vector<4x8xf32>
    %50 = math.exp %49 : vector<4x8xf32>
    %cst_33 = arith.constant 1.000000e+00 : f32
    %51 = vector.broadcast %cst_33 : f32 to vector<4x8xf32>
    %52 = arith.addf %51, %50 : vector<4x8xf32>
    %53 = arith.divf %51, %52 : vector<4x8xf32>
    %c0_34 = arith.constant 0 : index
    %c0_35 = arith.constant 0 : index
    %54 = vector.load %arg13[%c0_34, %c0_35] : memref<4x8xf32, #tpu.memory_space<vmem>>, vector<4x8xf32>
    tpu.vector_store %arg13[%c0_34, %c0_35], %53 {strides = array<i32>} : memref<4x8xf32, #tpu.memory_space<vmem>>, vector<4x8xf32>,
    return
  }
  func.func @transform_0(%arg0: i32) -> (i32, i32) {
    %c0_i32 = arith.constant 0 : i32
    %c0_i32_0 = arith.constant 0 : i32
    return %c0_i32, %arg0 : i32, i32
  }
  func.func @transform_1(%arg0: i32) -> (i32, i32) {
    %c0_i32 = arith.constant 0 : i32
    %c0_i32_0 = arith.constant 0 : i32
    %c0_i32_1 = arith.constant 0 : i32
    return %c0_i32, %c0_i32_0 : i32, i32
  }
  func.func @transform_2(%arg0: i32) -> (i32, i32) {
    %c0_i32 = arith.constant 0 : i32
    %c0_i32_0 = arith.constant 0 : i32
    %c0_i32_1 = arith.constant 0 : i32
    return %c0_i32, %c0_i32_0 : i32, i32
  }
  func.func @transform_3(%arg0: i32) -> (i32, i32) {
    %c0_i32 = arith.constant 0 : i32
    %c0_i32_0 = arith.constant 0 : i32
    %c0_i32_1 = arith.constant 0 : i32
    return %c0_i32, %c0_i32_0 : i32, i32
  }
  func.func @transform_4(%arg0: i32) -> (i32, i32) {
    %c0_i32 = arith.constant 0 : i32
    %c0_i32_0 = arith.constant 0 : i32
    %c0_i32_1 = arith.constant 0 : i32
    return %c0_i32, %c0_i32_0 : i32, i32
  }
  func.func @transform_5(%arg0: i32) -> (i32, i32) {
    %c0_i32 = arith.constant 0 : i32
    %c0_i32_0 = arith.constant 0 : i32
    %c0_i32_1 = arith.constant 0 : i32
    return %c0_i32, %c0_i32_0 : i32, i32
  }
  func.func @transform_6(%arg0: i32) -> (i32, i32) {
    %c0_i32 = arith.constant 0 : i32
    %c0_i32_0 = arith.constant 0 : i32
    %c0_i32_1 = arith.constant 0 : i32
    return %c0_i32, %c0_i32_0 : i32, i32
  }
  func.func @transform_7(%arg0: i32) -> (i32, i32) {
    %c0_i32 = arith.constant 0 : i32
    %c0_i32_0 = arith.constant 0 : i32
    %c0_i32_1 = arith.constant 0 : i32
    return %c0_i32, %c0_i32_0 : i32, i32
  }
  func.func @transform_8(%arg0: i32) -> (i32, i32) {
    %c0_i32 = arith.constant 0 : i32
    %c0_i32_0 = arith.constant 0 : i32
    %c0_i32_1 = arith.constant 0 : i32
    return %c0_i32, %c0_i32_0 : i32, i32
  }
  func.func @transform_9(%arg0: i32) -> (i32, i32) {
    %c0_i32 = arith.constant 0 : i32
    %c0_i32_0 = arith.constant 0 : i32
    %c0_i32_1 = arith.constant 0 : i32
    return %c0_i32, %c0_i32_0 : i32, i32
  }
  func.func @transform_10(%arg0: i32) -> (i32, i32) {
    %c0_i32 = arith.constant 0 : i32
    %c0_i32_0 = arith.constant 0 : i32
    %c0_i32_1 = arith.constant 0 : i32
    return %c0_i32, %c0_i32_0 : i32, i32
  }
  func.func @transform_11(%arg0: i32) -> (i32, i32) {
    %c0_i32 = arith.constant 0 : i32
    %c0_i32_0 = arith.constant 0 : i32
    %c0_i32_1 = arith.constant 0 : i32
    return %c0_i32, %c0_i32_0 : i32, i32
  }
  func.func @transform_12(%arg0: i32) -> (i32, i32) {
    %c0_i32 = arith.constant 0 : i32
    %c0_i32_0 = arith.constant 0 : i32
    return %c0_i32, %arg0 : i32, i32
  }
}

</mosaic_0001>

<bundles_post_ra>
// kernel: tpu_custom_call.1
= control target key start
LH: loop header
LB: loop body
LE: loop exit
PB: predicated region body
PF: predicated region fallthrough
CT: control target
= control target key end

     0   :  { %v1157_v3 = vmov 0   ;;  %s1542_s0 = inlined_call_operand.vmem [shape: f32[32,8], index: 0, kind: input, shape index: {}]   ;;  %s1543_s1 = inlined_call_operand.vmem [shape: bf16[36,32], index: 1, kind: input, shape index: {}]   ;;  %s1544_s2 = inlined_call_operand.vmem [shape: f32[36,1], index: 2, kind: input, shape index: {}]   ;;  %s1545_s3 = inlined_call_operand.vmem [shape: bf16[72,36], index: 3, kind: input, shape index: {}]   ;;  %s1546_s4 = inlined_call_operand.vmem [shape: f32[72,1], index: 4, kind: input, shape index: {}]   ;;  %s1547_s5 = inlined_call_operand.vmem [shape: bf16[144,72], index: 5, kind: input, shape index: {}]   ;;  %s1548_s6 = inlined_call_operand.vmem [shape: f32[144,1], index: 6, kind: input, shape index: {}]   ;;  %s1549_s7 = inlined_call_operand.vmem [shape: bf16[72,144], index: 7, kind: input, shape index: {}]   ;;  %s1550_s8 = inlined_call_operand.vmem [shape: f32[72,1], index: 8, kind: input, shape index: {}]   ;;  %s1551_s9 = inlined_call_operand.vmem [shape: bf16[36,72], index: 9, kind: input, shape index: {}]   ;;  %s1552_s10 = inlined_call_operand.vmem [shape: f32[36,1], index: 10, kind: input, shape index: {}]   ;;  %s1553_s11 = inlined_call_operand.vmem [shape: bf16[4,36], index: 11, kind: input, shape index: {}]   ;;  %s1554_s12 = inlined_call_operand.hbm [shape: f32[4,8], index: 12, kind: output, shape index: {}]  }
   0x1   :  { %v58_v0 = vld [vmem:[%s1544_s2 + $0x20] sm:$0xf]  ;;  %v57_v1 = vld [vmem:[%s1544_s2 + $0x18] sm:$0xff]  ;;  %v55_v2 = vld [vmem:[%s1544_s2 + $0x8] sm:$0xff]  ;;  %1126 = vset.pattern.permute.xlu2 %v1157_v3  ;;  %1125 = vset.pattern.permute.xlu1 %v1157_v3 }
   0x2   :  { %v45_v4 = vld [vmem:[%s1542_s0 + $0x10] sm:$0xff]  ;;  %v46_v5 = vld [vmem:[%s1542_s0 + $0x18] sm:$0xff]  ;;  %v43_v6 = vld [vmem:[%s1542_s0] sm:$0xff]  ;;  %1124 = vset.pattern.permute.xlu0 %v1157_v3  ;;  %76 = vperm.xlu1 %1125, %v57_v1  }
   0x3   :  { %v48_v7 = vpack.c.bf16 %v46_v5, %v45_v4  ;;  %v44_v8 = vld [vmem:[%s1542_s0 + $0x8] sm:$0xff]  ;;  %81 = vperm.xlu0 %1124, %v58_v0   ;;  %66 = vperm.xlu2 %1126, %v55_v2   ;;  %v54_v10 = vld [vmem:[%s1544_s2] sm:$0xff] }
   0x4   :  { %v47_v9 = vpack.c.bf16 %v44_v8, %v43_v6 }
   0x5   :  { %113 = vmatpush.bf16.msra.mxu0 %v48_v7 }
   0x6   :  { %17 = vsyncpa [#allocation3], 0  ;;  %v56_v11 = vld [vmem:[%s1544_s2 + $0x10] sm:$0xff]  ;;  %v160_v12 = vld [vmem:[%s1546_s4 + $0x40] sm:$0xff]  ;;  %vm97_vm0 = vcmask 261120   ;;  %vm245_vm1 = vcmask 1041408  }
   0x7   :  { %v1097_v13 = vld [vmem:[%s1543_s1] sm:$0xff]  ;;  %v159_v14 = vld [vmem:[%s1546_s4 + $0x38] sm:$0xff]  ;;  %v158_v15 = vld [vmem:[%s1546_s4 + $0x30] sm:$0xff]  ;;  %vm229_vm2 = vcmask 293888   ;;  %vm504_vm3 = vcmask 1043456   ;;  %vm476_vm4 = vcmask 588800  }
   0x8   :  { %v156_v16 = vld [vmem:[%s1546_s4 + $0x20] sm:$0xff]  ;;  %v154_v17 = vld [vmem:[%s1546_s4 + $0x10] sm:$0xff]  ;;  %v157_v18 = vld [vmem:[%s1546_s4 + $0x28] sm:$0xff]  ;;  %vm712_vm5 = vcmask 130048   ;;  %s1158_s29 = smov [#allocation2]   ;;  %s961_s13 = sshll.u32 %s1554_s12, 4  ;;  %s962_s13 = int_to_ptr.hbm [resolvable:$true] %s961_s13 }
   0x9   :  { %114 = vmatpush.bf16.msra.mxu0 %v47_v9  ;;  %v155_v19 = vld [vmem:[%s1546_s4 + $0x18] sm:$0xff]  ;;  %v1098_v20 = vld [vmem:[%s1543_s1 + $0x8] sm:$0xff]  ;;  %v152_v22 = vld [vmem:[%s1546_s4] sm:$0xff]  ;;  %vm952_vm9 = vcmask 60416  }
   0xa   :  { %61 = vperm.xlu1 %1125, %v54_v10   ;;  %v153_v21 = vld [vmem:[%s1546_s4 + $0x8] sm:$0xff]  ;;  %v337_v23 = vld [vmem:[%s1548_s6 + $0x70] sm:$0xff]  ;;  %v335_v26 = vld [vmem:[%s1548_s6 + $0x60] sm:$0xff] }
   0xb   :  { %71 = vperm.xlu0 %1124, %v56_v11   ;;  %203 = vperm.xlu2 %1126, %v160_v12   ;;  %v53_v24 = vld [vmem:[%s1543_s1 + $0x10] sm:$0x3]  ;;  %v338_v27 = vld [vmem:[%s1548_s6 + $0x78] sm:$0xff]  ;;  %v336_v28 = vld [vmem:[%s1548_s6 + $0x68] sm:$0xff]  ;;  %s959_s1 = sshll.u32 %s1158_s29, 4  ;;  %s960_s1 = int_to_ptr.vmem [resolvable:$true] %s959_s1 }
   0xc   :  { %978 = vmatmul.msk.bf16.vlgmr.msra.gmra.mxu0 %vm97_vm0, %v1097_v13  ;;  %v93_v25 = vunpack.c.l.b16 %v53_v24  ;;  %v334_v30 = vld [vmem:[%s1548_s6 + $0x58] sm:$0xff]  ;;  %v333_v31 = vld [vmem:[%s1548_s6 + $0x50] sm:$0xff]  ;;  %v331_v32 = vld [vmem:[%s1548_s6 + $0x40] sm:$0xff] }
   0xd   :  { %v329_v33 = vld [vmem:[%s1548_s6 + $0x30] sm:$0xff]  ;;  %v332_v34 = vld [vmem:[%s1548_s6 + $0x48] sm:$0xff]  ;;  %v330_v35 = vld [vmem:[%s1548_s6 + $0x38] sm:$0xff] }
   0xe   :  { %v96_v29 = vpack.c.b16 %v93_v25, %v93_v25  ;;  %v328_v36 = vld [vmem:[%s1548_s6 + $0x28] sm:$0xff]  ;;  %v327_v37 = vld [vmem:[%s1548_s6 + $0x20] sm:$0xff]  ;;  %v325_v38 = vld [vmem:[%s1548_s6 + $0x10] sm:$0xff] }
   0xf   :  { %v323_v39 = vld [vmem:[%s1548_s6] sm:$0xff]  ;;  %v326_v40 = vld [vmem:[%s1548_s6 + $0x18] sm:$0xff]  ;;  %v324_v41 = vld [vmem:[%s1548_s6 + $0x8] sm:$0xff] }
  0x10   :  { %v340_v42 = vld [vmem:[%s1548_s6 + $0x88] sm:$0xff]  ;;  %v339_v43 = vld [vmem:[%s1548_s6 + $0x80] sm:$0xff]  ;;  %v623_v45 = vld [vmem:[%s1550_s8 + $0x38] sm:$0xff] }
  0x11   :  { %v624_v44 = vld [vmem:[%s1550_s8 + $0x40] sm:$0xff]  ;;  %v622_v46 = vld [vmem:[%s1550_s8 + $0x30] sm:$0xff]  ;;  %v621_v49 = vld [vmem:[%s1550_s8 + $0x28] sm:$0xff] }
  0x12   :  { %198 = vperm.xlu1 %1125, %v159_v14   ;;  %v620_v47 = vld [vmem:[%s1550_s8 + $0x20] sm:$0xff]  ;;  %v618_v48 = vld [vmem:[%s1550_s8 + $0x10] sm:$0xff]  ;;  %v619_v50 = vld [vmem:[%s1550_s8 + $0x18] sm:$0xff] }
  0x13   :  { %193 = vperm.xlu0 %1124, %v158_v15   ;;  %183 = vperm.xlu2 %1126, %v156_v16   ;;  %v617_v51 = vld [vmem:[%s1550_s8 + $0x8] sm:$0xff]  ;;  %v616_v52 = vld [vmem:[%s1550_s8] sm:$0xff]  ;;  %v825_v54 = vld [vmem:[%s1552_s10 + $0x18] sm:$0xff] }
  0x14   :  { %v826_v53 = vld [vmem:[%s1552_s10 + $0x20] sm:$0xf]  ;;  %v824_v55 = vld [vmem:[%s1552_s10 + $0x10] sm:$0xff]  ;;  %v823_v57 = vld [vmem:[%s1552_s10 + $0x8] sm:$0xff] }
  0x15   :  { %v822_v56 = vld [vmem:[%s1552_s10] sm:$0xff]  ;;  %v1100_v25 = vld [vmem:[%s1545_s3 + $0x8] sm:$0xff] }
  0x16   :  { %v1099_v24 = vld [vmem:[%s1545_s3] sm:$0xff] }
  0x1a   :  { %173 = vperm.xlu1 %1125, %v154_v17  }
  0x1b   :  { %188 = vperm.xlu0 %1124, %v157_v18   ;;  %178 = vperm.xlu2 %1126, %v155_v19  }
  0x1c   :  { %979 = vmatmul.msk.bf16.gmra.mxu0 %vm97_vm0, %v1098_v20 }
  0x22   :  { %168 = vperm.xlu1 %1125, %v153_v21  }
  0x23   :  { %163 = vperm.xlu0 %1124, %v152_v22   ;;  %413 = vperm.xlu2 %1126, %v337_v23  }
  0x2a   :  { %403 = vperm.xlu1 %1125, %v335_v26   ;;  %v1101_v26 = vld [vmem:[%s1545_s3 + $0x10] sm:$0xff] }
  0x2b   :  { %418 = vperm.xlu0 %1124, %v338_v27   ;;  %408 = vperm.xlu2 %1126, %v336_v28   ;;  %v1102_v27 = vld [vmem:[%s1545_s3 + $0x18] sm:$0xff]  ;;  %v151_v28 = vld [vmem:[%s1545_s3 + $0x20] sm:$0xf] }
  0x2c   :  { %980 = vmatmul.msk.bf16.gmra.mxu0 %vm97_vm0, %v96_v29  ;;  %v223_v29 = vunpack.c.l.b16 %v151_v28 }
  0x32   :  { %398 = vperm.xlu1 %1125, %v334_v30   ;;  %v228_v30 = vpack.c.b16 %v223_v29, %v223_v29 }
  0x33   :  { %393 = vperm.xlu0 %1124, %v333_v31   ;;  %383 = vperm.xlu2 %1126, %v331_v32  }
  0x3a   :  { %373 = vperm.xlu1 %1125, %v329_v33  }
  0x3b   :  { %388 = vperm.xlu0 %1124, %v332_v34   ;;  %378 = vperm.xlu2 %1126, %v330_v35  }
  0x42   :  { %368 = vperm.xlu1 %1125, %v328_v36  }
  0x43   :  { %363 = vperm.xlu0 %1124, %v327_v37   ;;  %353 = vperm.xlu2 %1126, %v325_v38  }
  0x4a   :  { %343 = vperm.xlu1 %1125, %v323_v39  }
  0x4b   :  { %358 = vperm.xlu0 %1124, %v326_v40   ;;  %348 = vperm.xlu2 %1126, %v324_v41  }
  0x52   :  { %428 = vperm.xlu1 %1125, %v340_v42  }
  0x53   :  { %423 = vperm.xlu0 %1124, %v339_v43   ;;  %667 = vperm.xlu2 %1126, %v624_v44  }
  0x5a   :  { %662 = vperm.xlu1 %1125, %v623_v45  }
  0x5b   :  { %657 = vperm.xlu0 %1124, %v622_v46   ;;  %647 = vperm.xlu2 %1126, %v620_v47  }
  0x5d   :  { %v67_v5 = vpop.permute.xlu2 %66 }
  0x62   :  { %637 = vperm.xlu1 %1125, %v618_v48  }
  0x63   :  { %652 = vperm.xlu0 %1124, %v621_v49   ;;  %642 = vperm.xlu2 %1126, %v619_v50  }
  0x6a   :  { %632 = vperm.xlu1 %1125, %v617_v51   ;;  %v204_v51 = vpop.permute.xlu2 %203 }
  0x6b   :  { %627 = vperm.xlu0 %1124, %v616_v52   ;;  %849 = vperm.xlu2 %1126, %v826_v53  }
  0x72   :  { %844 = vperm.xlu1 %1125, %v825_v54   ;;  %v184_v53 = vpop.permute.xlu2 %183 }
  0x73   :  { %839 = vperm.xlu0 %1124, %v824_v55   ;;  %829 = vperm.xlu2 %1126, %v822_v56  }
  0x74   :  { %v77_v63 = vpop.permute.xlu1 %76 }
  0x75   :  { %v82_v61 = vpop.permute.xlu0 %81 }
  0x7b   :  { %834 = vperm.xlu0 %1124, %v823_v57  }
  0x7c   :  { %v62_v9 = vpop.permute.xlu1 %61 }
  0x7d   :  { %v72_v2 = vpop.permute.xlu0 %71 }
  0x84   :  { %v199_v32 = vpop.permute.xlu1 %198 }
  0x85   :  { %v194_v31 = vpop.permute.xlu0 %193 }
  0x89   :  { %v116_v58 = vpop.f32.mrf.mxu0 }
  0x8a   :  { %v117_v11 = vadd.f32 %v116_v58, %v62_v9 }
  0x8c   :  { %v130_v18 = vmul.f32 0.01, %v117_v11  ;;  %v174_v34 = vpop.permute.xlu1 %173 }
  0x8d   :  { %v189_v33 = vpop.permute.xlu0 %188 }
  0x8e   :  { %v135_v22 = vmax.f32 %v117_v11, %v130_v18 }
  0x91   :  { %v118_v59 = vpop.f32.mrf.mxu0 }
  0x92   :  { %v119_v7 = vadd.f32 %v118_v59, %v67_v5 }
  0x94   :  { %v131_v14 = vmul.f32 0.01, %v119_v7  ;;  %v169_v38 = vpop.permute.xlu1 %168 }
  0x95   :  { %v164_v36 = vpop.permute.xlu0 %163 }
  0x96   :  { %v136_v20 = vmax.f32 %v119_v7, %v131_v14 }
  0x98   :  { %v140_v23 = vpack.c.bf16 %v136_v20, %v135_v22  ;;  %v1104_v20 = vld [vmem:[%s1547_s5 + $0x8] sm:$0xff]  ;;  %v1106_v22 = vld [vmem:[%s1547_s5 + $0x18] sm:$0xff] }
  0x99   :  { %v121_v60 = vpop.f32.mrf.mxu0 }
  0x9a   :  { %v122_v4 = vadd.f32 %v121_v60, %v72_v2 }
  0x9c   :  { %v132_v12 = vmul.f32 0.01, %v122_v4 }
  0x9e   :  { %v137_v19 = vmax.f32 %v122_v4, %v132_v12 }
  0xa1   :  { %v123_v62 = vpop.f32.mrf.mxu0 }
  0xa2   :  { %v124_v0 = vadd.f32 %v123_v62, %v77_v63 }
  0xa4   :  { %v133_v8 = vmul.f32 0.01, %v124_v0 }
  0xa6   :  { %v138_v15 = vmax.f32 %v124_v0, %v133_v8  ;;  %v179_v0 = vpop.permute.xlu2 %178 }
  0xa8   :  { %v141_v21 = vpack.c.bf16 %v138_v15, %v137_v19  ;;  %v1103_v19 = vld [vmem:[%s1547_s5] sm:$0xff] }
  0xa9   :  { %v126_v1 = vpop.f32.mrf.mxu0 }
  0xaa   :  { %v127_v3 = vadd.f32 %v126_v1, %v82_v61 }
  0xac   :  { %v134_v6 = vmul.f32 0.01, %v127_v3 }
  0xae   :  { %v139_v10 = vmax.f32 %v127_v3, %v134_v6 }
  0xb0   :  { %v142_v13 = vpack.c.bf16 %v139_v10, %v139_v10 }
  0xb1   :  { %v128_v16 = vpop.f32.mrf.mxu0 }
  0xb2   :  { %v247_v17 = vsel %vm245_vm1, %v142_v13, 0 }
  0xb3   :  { %254 = vmatpush.bf16.msra.mxu1 %v247_v17 }
  0xb7   :  { %255 = vmatpush.bf16.msra.mxu1 %v141_v21  ;;  %v1105_v21 = vld [vmem:[%s1547_s5 + $0x10] sm:$0xff] }
  0xbb   :  { %256 = vmatpush.bf16.msra.mxu1 %v140_v23  ;;  %v1107_v23 = vld [vmem:[%s1547_s5 + $0x20] sm:$0xff] }
  0xbe   :  { %997 = vmatmul.msk.bf16.vlgmr.msra.gmra.mxu1 %vm229_vm2, %v1099_v24  ;;  %v1108_v24 = vld [vmem:[%s1547_s5 + $0x28] sm:$0xff] }
  0xce   :  { %998 = vmatmul.msk.bf16.gmra.mxu1 %vm229_vm2, %v1100_v25  ;;  %v1432_v25 = vpop.permute.xlu2 %413 }
  0xd6   :  { %v409_v28 = vpop.permute.xlu2 %408 }
  0xde   :  { %999 = vmatmul.msk.bf16.gmra.mxu1 %vm229_vm2, %v1101_v26  ;;  %v1109_v26 = vld [vmem:[%s1547_s5 + $0x30] sm:$0xff] }
  0xee   :  { %1000 = vmatmul.msk.bf16.gmra.mxu1 %vm229_vm2, %v1102_v27  ;;  %v1437_v27 = vpop.permute.xlu1 %403 }
  0xf6   :  { %v1440_v29 = vpop.permute.xlu1 %398 }
  0xfe   :  { %1001 = vmatmul.msk.bf16.gmra.mxu1 %vm229_vm2, %v228_v30  ;;  %v1110_v30 = vld [vmem:[%s1547_s5 + $0x38] sm:$0xff] }
 0x13b   :  { %v258_v35 = vpop.f32.mrf.mxu1 }
 0x13c   :  { %v259_v37 = vadd.f32 %v258_v35, %v164_v36  ;;  %v1111_v35 = vld [vmem:[%s1547_s5 + $0x40] sm:$0xff] }
 0x13e   :  { %v282_v40 = vmul.f32 0.01, %v259_v37 }
 0x140   :  { %v291_v43 = vmax.f32 %v259_v37, %v282_v40 }
 0x143   :  { %v260_v39 = vpop.f32.mrf.mxu1 }
 0x144   :  { %v261_v41 = vadd.f32 %v260_v39, %v169_v38 }
 0x146   :  { %v283_v42 = vmul.f32 0.01, %v261_v41 }
 0x148   :  { %v292_v44 = vmax.f32 %v261_v41, %v283_v42 }
 0x14a   :  { %v300_v45 = vpack.c.bf16 %v292_v44, %v291_v43 }
 0x14b   :  { %v263_v46 = vpop.f32.mrf.mxu1 }
 0x14c   :  { %v264_v7 = vadd.f32 %v263_v46, %v174_v34 }
 0x14e   :  { %v284_v13 = vmul.f32 0.01, %v264_v7 }
 0x150   :  { %v293_v17 = vmax.f32 %v264_v7, %v284_v13 }
 0x153   :  { %v265_v47 = vpop.f32.mrf.mxu1 }
 0x154   :  { %v266_v2 = vadd.f32 %v265_v47, %v179_v0 }
 0x156   :  { %v285_v10 = vmul.f32 0.01, %v266_v2 }
 0x158   :  { %v294_v15 = vmax.f32 %v266_v2, %v285_v10 }
 0x15a   :  { %v301_v18 = vpack.c.bf16 %v294_v15, %v293_v17 }
 0x15b   :  { %v268_v48 = vpop.f32.mrf.mxu1 }
 0x15c   :  { %v269_v62 = vadd.f32 %v268_v48, %v184_v53 }
 0x15e   :  { %v286_v8 = vmul.f32 0.01, %v269_v62 }
 0x160   :  { %v295_v14 = vmax.f32 %v269_v62, %v286_v8 }
 0x163   :  { %v270_v49 = vpop.f32.mrf.mxu1 }
 0x164   :  { %v271_v59 = vadd.f32 %v270_v49, %v189_v33  ;;  %v374_v33 = vpop.permute.xlu1 %373 }
 0x166   :  { %v287_v3 = vmul.f32 0.01, %v271_v59 }
 0x168   :  { %v296_v11 = vmax.f32 %v271_v59, %v287_v3 }
 0x16a   :  { %v302_v16 = vpack.c.bf16 %v296_v11, %v295_v14 }
 0x16b   :  { %v273_v50 = vpop.f32.mrf.mxu1 }
 0x16c   :  { %v274_v57 = vadd.f32 %v273_v50, %v194_v31  ;;  %v1445_v31 = vpop.permute.xlu2 %383  ;;  %v369_v37 = vpop.permute.xlu1 %368 }
 0x16e   :  { %v288_v63 = vmul.f32 0.01, %v274_v57 }
 0x170   :  { %v297_v9 = vmax.f32 %v274_v57, %v288_v63 }
 0x173   :  { %v275_v52 = vpop.f32.mrf.mxu1 }
 0x174   :  { %v276_v54 = vadd.f32 %v275_v52, %v199_v32  ;;  %v419_v32 = vpop.permute.xlu0 %418  ;;  %v379_v34 = vpop.permute.xlu2 %378 }
 0x175   :  { %v344_v41 = vpop.permute.xlu1 %343 }
 0x176   :  { %v289_v60 = vmul.f32 0.01, %v276_v54 }
 0x178   :  { %v298_v4 = vmax.f32 %v276_v54, %v289_v60 }
 0x17a   :  { %v303_v12 = vpack.c.bf16 %v298_v4, %v297_v9 }
 0x17b   :  { %v278_v55 = vpop.f32.mrf.mxu1 }
 0x17c   :  { %v279_v56 = vadd.f32 %v278_v55, %v204_v51  ;;  %v394_v36 = vpop.permute.xlu0 %393  ;;  %v354_v38 = vpop.permute.xlu2 %353 }
 0x17e   :  { %v290_v58 = vmul.f32 0.01, %v279_v56 }
 0x180   :  { %v299_v61 = vmax.f32 %v279_v56, %v290_v58 }
 0x182   :  { %v304_v1 = vpack.c.bf16 %v299_v61, %v299_v61 }
 0x183   :  { %v280_v5 = vpop.f32.mrf.mxu1 }
 0x184   :  { %v506_v6 = vsel %vm504_vm3, %v304_v1, 0  ;;  %v389_v40 = vpop.permute.xlu0 %388  ;;  %v349_v43 = vpop.permute.xlu2 %348 }
 0x185   :  { %511 = vmatpush.bf16.msra.mxu2 %v506_v6 }
 0x189   :  { %512 = vmatpush.bf16.msra.mxu2 %v303_v12 }
 0x18c   :  { %v364_v50 = vpop.permute.xlu0 %363 }
 0x18d   :  { %513 = vmatpush.bf16.msra.mxu2 %v302_v16 }
 0x191   :  { %514 = vmatpush.bf16.msra.mxu2 %v301_v18 }
 0x194   :  { %v359_v54 = vpop.permute.xlu0 %358 }
 0x195   :  { %515 = vmatpush.bf16.msra.mxu2 %v300_v45 }
 0x198   :  { %1038 = vmatmul.msk.bf16.vlgmr.msra.gmra.mxu2 %vm476_vm4, %v1103_v19 }
 0x1a8   :  { %1039 = vmatmul.msk.bf16.gmra.mxu2 %vm476_vm4, %v1104_v20 }
 0x1b8   :  { %1040 = vmatmul.msk.bf16.gmra.mxu2 %vm476_vm4, %v1105_v21 }
 0x1c8   :  { %1041 = vmatmul.msk.bf16.gmra.mxu2 %vm476_vm4, %v1106_v22 }
 0x1d8   :  { %1042 = vmatmul.msk.bf16.gmra.mxu2 %vm476_vm4, %v1107_v23 }
 0x1e8   :  { %1043 = vmatmul.msk.bf16.gmra.mxu2 %vm476_vm4, %v1108_v24 }
 0x1f8   :  { %1044 = vmatmul.msk.bf16.gmra.mxu2 %vm476_vm4, %v1109_v26 }
 0x208   :  { %1045 = vmatmul.msk.bf16.gmra.mxu2 %vm476_vm4, %v1110_v30 }
 0x218   :  { %1046 = vmatmul.msk.bf16.gmra.mxu2 %vm476_vm4, %v1111_v35 }
 0x21b   :  { %v517_v39 = vpop.f32.mrf.mxu2 }
 0x21c   :  { %v518_v42 = vadd.f32 %v517_v39, %v344_v41 }
 0x21e   :  { %v562_v45 = vmul.f32 0.01, %v518_v42 }
 0x220   :  { %v580_v48 = vmax.f32 %v518_v42, %v562_v45 }
 0x223   :  { %v519_v44 = vpop.f32.mrf.mxu2 }
 0x224   :  { %v520_v46 = vadd.f32 %v519_v44, %v349_v43 }
 0x226   :  { %v563_v47 = vmul.f32 0.01, %v520_v46 }
 0x228   :  { %v581_v49 = vmax.f32 %v520_v46, %v563_v47 }
 0x22a   :  { %v1452_v51 = vpack.c.bf16 %v581_v49, %v580_v48 }
 0x22b   :  { %v522_v52 = vpop.f32.mrf.mxu2 }
 0x22c   :  { %v523_v53 = vadd.f32 %v522_v52, %v354_v38 }
 0x22e   :  { %v564_v56 = vmul.f32 0.01, %v523_v53 }
 0x230   :  { %v582_v59 = vmax.f32 %v523_v53, %v564_v56 }
 0x233   :  { %v524_v55 = vpop.f32.mrf.mxu2 }
 0x234   :  { %v525_v57 = vadd.f32 %v524_v55, %v359_v54 }
 0x236   :  { %v565_v58 = vmul.f32 0.01, %v525_v57 }
 0x238   :  { %v583_v60 = vmax.f32 %v525_v57, %v565_v58 }
 0x23a   :  { %v1454_v61 = vpack.c.bf16 %v583_v60, %v582_v59 }
 0x23b   :  { %v527_v62 = vpop.f32.mrf.mxu2 }
 0x23c   :  { %v528_v63 = vadd.f32 %v527_v62, %v364_v50 }
 0x23e   :  { %v566_v1 = vmul.f32 0.01, %v528_v63 }
 0x240   :  { %v584_v4 = vmax.f32 %v528_v63, %v566_v1  ;;  %v1051_v1 = vld [vmem:[%s1549_s7 + $0x8] sm:$0xf0] }
 0x243   :  { %v529_v0 = vpop.f32.mrf.mxu2 }
 0x244   :  { %v530_v2 = vadd.f32 %v529_v0, %v369_v37  ;;  %v1112_v0 = vld [vmem:[%s1549_s7 + $0x4] sm:$0xf] }
 0x246   :  { %v567_v3 = vmul.f32 0.01, %v530_v2 }
 0x248   :  { %v585_v5 = vmax.f32 %v530_v2, %v567_v3  ;;  %v1054_v3 = vor.u32 %v1112_v0, %v1051_v1 }
 0x24a   :  { %v1456_v6 = vpack.c.bf16 %v585_v5, %v584_v4  ;;  %v1049_v4 = vld [vmem:[%s1549_s7] sm:$0xf]  ;;  %v1113_v5 = vld [vmem:[%s1549_s7 + $0x4] sm:$0xf0] }
 0x24b   :  { %v532_v7 = vpop.f32.mrf.mxu2 }
 0x24c   :  { %v533_v8 = vadd.f32 %v532_v7, %v374_v33  ;;  %v1050_v7 = vor.u32 %v1113_v5, %v1049_v4 }
 0x24e   :  { %v568_v10 = vmul.f32 0.01, %v533_v8 }
 0x250   :  { %v586_v13 = vmax.f32 %v533_v8, %v568_v10  ;;  %v1114_v8 = vld [vmem:[%s1549_s7 + $0x14] sm:$0xf] }
 0x253   :  { %v534_v9 = vpop.f32.mrf.mxu2 }
 0x254   :  { %v535_v11 = vadd.f32 %v534_v9, %v379_v34  ;;  %v1057_v9 = vld [vmem:[%s1549_s7 + $0x10] sm:$0xf] }
 0x256   :  { %v569_v12 = vmul.f32 0.01, %v535_v11 }
 0x258   :  { %v587_v14 = vmax.f32 %v535_v11, %v569_v12  ;;  %v1116_v11 = vld [vmem:[%s1549_s7 + $0x24] sm:$0xf]  ;;  %v1067_v12 = vld [vmem:[%s1549_s7 + $0x28] sm:$0xf0] }
 0x25a   :  { %v601_v15 = vpack.c.bf16 %v587_v14, %v586_v13  ;;  %v1070_v13 = vor.u32 %v1116_v11, %v1067_v12  ;;  %v1065_v14 = vld [vmem:[%s1549_s7 + $0x20] sm:$0xf] }
 0x25b   :  { %v537_v16 = vpop.f32.mrf.mxu2 }
 0x263   :  { %v539_v17 = vpop.f32.mrf.mxu2 }
 0x264   :  { %v540_v44 = vadd.f32 %v539_v17, %v389_v40  ;;  %v429_v40 = vpop.permute.xlu1 %428  ;;  %v1118_v17 = vld [vmem:[%s1549_s7 + $0x34] sm:$0xf] }
 0x26b   :  { %v542_v18 = vpop.f32.mrf.mxu2 }
 0x26c   :  { %v543_v39 = vadd.f32 %v542_v18, %v394_v36  ;;  %v1075_v18 = vld [vmem:[%s1549_s7 + $0x38] sm:$0xf0] }
 0x273   :  { %v544_v19 = vpop.f32.mrf.mxu2 }
 0x274   :  { %v545_v34 = vadd.f32 %v544_v19, %v1440_v29  ;;  %v424_v29 = vpop.permute.xlu0 %423  ;;  %v1078_v19 = vor.u32 %v1118_v17, %v1075_v18 }
 0x276   :  { %v573_v45 = vmul.f32 0.01, %v545_v34 }
 0x27b   :  { %v547_v20 = vpop.f32.mrf.mxu2 }
 0x27c   :  { %v548_v30 = vadd.f32 %v547_v20, %v1437_v27  ;;  %v571_v27 = vmul.f32 0.01, %v540_v44  ;;  %v1073_v20 = vld [vmem:[%s1549_s7 + $0x30] sm:$0xf] }
 0x27e   :  { %v574_v41 = vmul.f32 0.01, %v548_v30  ;;  %v589_v54 = vmax.f32 %v540_v44, %v571_v27 }
 0x280   :  { %v592_v49 = vmax.f32 %v548_v30, %v574_v41 }
 0x283   :  { %v549_v21 = vpop.f32.mrf.mxu2 }
 0x284   :  { %v550_v24 = vadd.f32 %v549_v21, %v409_v28  ;;  %v572_v28 = vmul.f32 0.01, %v543_v39  ;;  %v1119_v21 = vld [vmem:[%s1549_s7 + $0x34] sm:$0xf0] }
 0x286   :  { %v575_v37 = vmul.f32 0.01, %v550_v24  ;;  %v590_v53 = vmax.f32 %v543_v39, %v572_v28 }
 0x288   :  { %v593_v46 = vmax.f32 %v550_v24, %v575_v37  ;;  %v663_v37 = vpop.permute.xlu1 %662 }
 0x28a   :  { %v604_v50 = vpack.c.bf16 %v593_v46, %v592_v49 }
 0x28b   :  { %v552_v22 = vpop.f32.mrf.mxu2 }
 0x28c   :  { %v553_v23 = vadd.f32 %v552_v22, %v1432_v25  ;;  %v538_v25 = vadd.f32 %v537_v16, %v1445_v31  ;;  %v615_v22 = vld [vmem:[%s1549_s7 + $0x40] sm:$0xff] }
 0x28d   :  { %v696_v24 = vunpack.c.h.b16 %v615_v22  ;;  %v695_v30 = vunpack.c.l.b16 %v615_v22 }
 0x28e   :  { %v576_v33 = vmul.f32 0.01, %v553_v23  ;;  %v570_v52 = vmul.f32 0.01, %v538_v25 }
 0x290   :  { %v594_v42 = vmax.f32 %v553_v23, %v576_v33  ;;  %v588_v57 = vmax.f32 %v538_v25, %v570_v52  ;;  %v1074_v23 = vor.u32 %v1119_v21, %v1073_v20  ;;  %v705_v33 = vpack.c.b16 %v695_v30, %v695_v30  ;;  %v638_v41 = vpop.permute.xlu1 %637 }
 0x292   :  { %v602_v60 = vpack.c.bf16 %v589_v54, %v588_v57 }
 0x293   :  { %v554_v26 = vpop.f32.mrf.mxu2 }
 0x294   :  { %v555_v35 = vadd.f32 %v554_v26, %v419_v32  ;;  %v591_v32 = vmax.f32 %v545_v34, %v573_v45  ;;  %v706_v26 = vpack.c.b16 %v696_v24, %v696_v24 }
 0x296   :  { %v577_v38 = vmul.f32 0.01, %v555_v35  ;;  %v603_v55 = vpack.c.bf16 %v591_v32, %v590_v53 }
 0x298   :  { %v595_v43 = vmax.f32 %v555_v35, %v577_v38  ;;  %v658_v35 = vpop.permute.xlu0 %657  ;;  %v633_v25 = vpop.permute.xlu1 %632 }
 0x29a   :  { %v605_v47 = vpack.c.bf16 %v595_v43, %v594_v42 }
 0x29b   :  { %v557_v48 = vpop.f32.mrf.mxu2 }
 0x29c   :  { %728 = vmatpush.bf16.msra.mxu3 %v605_v47  ;;  %v558_v36 = vadd.f32 %v557_v48, %v424_v29  ;;  %v668_v47 = vpop.permute.xlu2 %667 }
 0x29e   :  { %v578_v58 = vmul.f32 0.01, %v558_v36 }
 0x2a0   :  { %729 = vmatpush.bf16.msra.mxu3 %v604_v50  ;;  %v596_v62 = vmax.f32 %v558_v36, %v578_v58  ;;  %v653_v38 = vpop.permute.xlu0 %652 }
 0x2a3   :  { %v559_v56 = vpop.f32.mrf.mxu2 }
 0x2a4   :  { %v560_v59 = vadd.f32 %v559_v56, %v429_v40  ;;  %730 = vmatpush.bf16.msra.mxu3 %v603_v55  ;;  %v648_v29 = vpop.permute.xlu2 %647 }
 0x2a6   :  { %v579_v31 = vmul.f32 0.01, %v560_v59 }
 0x2a8   :  { %v597_v63 = vmax.f32 %v560_v59, %v579_v31  ;;  %731 = vmatpush.bf16.msra.mxu3 %v602_v60  ;;  %v628_v43 = vpop.permute.xlu0 %627 }
 0x2aa   :  { %v606_v2 = vpack.c.bf16 %v597_v63, %v596_v62 }
 0x2ac   :  { %732 = vmatpush.bf16.msra.mxu3 %v601_v15  ;;  %768 = vmatpush.bf16.msrb.mxu0 %v606_v2  ;;  %v1117_v15 = vld [vmem:[%s1549_s7 + $0x24] sm:$0xf0]  ;;  %v643_v58 = vpop.permute.xlu2 %642 }
 0x2ad   :  { %v1066_v16 = vor.u32 %v1117_v15, %v1065_v14 }
 0x2af   :  { %1079 = vmatmul.msk.bf16.vlgmr.msrb.gmra.mxu0 %vm712_vm5, %v1054_v3 }
 0x2b0   :  { %733 = vmatpush.bf16.msra.mxu3 %v1456_v6  ;;  %v1059_v6 = vld [vmem:[%s1549_s7 + $0x18] sm:$0xf0] }
 0x2b4   :  { %734 = vmatpush.bf16.msra.mxu3 %v1454_v61  ;;  %v1062_v61 = vor.u32 %v1114_v8, %v1059_v6 }
 0x2b8   :  { %735 = vmatpush.bf16.msra.mxu3 %v1452_v51  ;;  %v1115_v51 = vld [vmem:[%s1549_s7 + $0x14] sm:$0xf0] }
 0x2b9   :  { %v1058_v10 = vor.u32 %v1115_v51, %v1057_v9 }
 0x2bb   :  { %736 = vmatmul.bf16.vlgmr.msra.gmra.mxu3 %v1050_v7 }
 0x2bf   :  { %1080 = vmatmul.msk.bf16.gmra.mxu0 %vm712_vm5, %v1062_v61 }
 0x2cb   :  { %741 = vmatmul.bf16.gmra.mxu3 %v1058_v10 }
 0x2cf   :  { %1081 = vmatmul.msk.bf16.gmra.mxu0 %vm712_vm5, %v1070_v13 }
 0x2db   :  { %746 = vmatmul.bf16.gmra.mxu3 %v1066_v16 }
 0x2df   :  { %1082 = vmatmul.msk.bf16.gmra.mxu0 %vm712_vm5, %v1078_v19 }
 0x2eb   :  { %751 = vmatmul.bf16.gmra.mxu3 %v1074_v23 }
 0x2ef   :  { %1083 = vmatmul.msk.bf16.gmra.mxu0 %vm712_vm5, %v706_v26 }
 0x2fb   :  { %756 = vmatmul.bf16.gmra.mxu3 %v705_v33 }
 0x32c   :  { %v770_v34 = vpop.f32.mrf.mxu0 }
 0x334   :  { %v772_v39 = vpop.f32.mrf.mxu0 }
 0x33c   :  { %v775_v42 = vpop.f32.mrf.mxu0 }
 0x33e   :  { %v737_v44 = vpop.f32.mrf.mxu3 }
 0x33f   :  { %v738_v45 = vadd.f32 %v737_v44, %v628_v43  ;;  %v1120_v43 = vld [vmem:[%s1551_s9] sm:$0xff]  ;;  %v1121_v44 = vld [vmem:[%s1551_s9 + $0x8] sm:$0xff] }
 0x341   :  { %v771_v46 = vadd.f32 %v770_v34, %v738_v45  ;;  %v821_v45 = vld [vmem:[%s1551_s9 + $0x10] sm:$0x3] }
 0x343   :  { %v794_v27 = vmul.f32 0.01, %v771_v46 }
 0x344   :  { %v777_v48 = vpop.f32.mrf.mxu0 }
 0x345   :  { %v803_v53 = vmax.f32 %v771_v46, %v794_v27  ;;  %v861_v46 = vunpack.c.l.b16 %v821_v45  ;;  %v840_v27 = vpop.permute.xlu0 %839 }
 0x346   :  { %v739_v28 = vpop.f32.mrf.mxu3 }
 0x347   :  { %v740_v49 = vadd.f32 %v739_v28, %v633_v25 }
 0x349   :  { %v773_v32 = vadd.f32 %v772_v39, %v740_v49 }
 0x34b   :  { %v795_v50 = vmul.f32 0.01, %v773_v32 }
 0x34c   :  { %v780_v52 = vpop.f32.mrf.mxu0 }
 0x34d   :  { %v804_v36 = vmax.f32 %v773_v32, %v795_v50  ;;  %v850_v32 = vpop.permute.xlu2 %849  ;;  %v845_v50 = vpop.permute.xlu1 %844 }
 0x34e   :  { %v742_v54 = vpop.f32.mrf.mxu3 }
 0x34f   :  { %v812_v55 = vpack.c.bf16 %v804_v36, %v803_v53  ;;  %v743_v40 = vadd.f32 %v742_v54, %v638_v41  ;;  %v835_v54 = vpop.permute.xlu0 %834 }
 0x351   :  { %v776_v57 = vadd.f32 %v775_v42, %v743_v40 }
 0x353   :  { %v796_v60 = vmul.f32 0.01, %v776_v57 }
 0x354   :  { %v782_v56 = vpop.f32.mrf.mxu0 }
 0x355   :  { %v805_v1 = vmax.f32 %v776_v57, %v796_v60  ;;  %v830_v57 = vpop.permute.xlu2 %829 }
 0x356   :  { %v744_v59 = vpop.f32.mrf.mxu3 }
 0x357   :  { %v745_v31 = vadd.f32 %v744_v59, %v643_v58 }
 0x359   :  { %v778_v62 = vadd.f32 %v777_v48, %v745_v31 }
 0x35b   :  { %v797_v63 = vmul.f32 0.01, %v778_v62 }
 0x35c   :  { %v785_v0 = vpop.f32.mrf.mxu0 }
 0x35d   :  { %v806_v2 = vmax.f32 %v778_v62, %v797_v63 }
 0x35e   :  { %v747_v3 = vpop.f32.mrf.mxu3 }
 0x35f   :  { %v813_v4 = vpack.c.bf16 %v806_v2, %v805_v1  ;;  %v748_v16 = vadd.f32 %v747_v3, %v648_v29 }
 0x361   :  { %v781_v22 = vadd.f32 %v780_v52, %v748_v16 }
 0x364   :  { %v787_v5 = vpop.f32.mrf.mxu0 }
 0x366   :  { %v749_v7 = vpop.f32.mrf.mxu3 }
 0x367   :  { %v750_v13 = vadd.f32 %v749_v7, %v653_v38 }
 0x369   :  { %v783_v19 = vadd.f32 %v782_v56, %v750_v13 }
 0x36b   :  { %v799_v30 = vmul.f32 0.01, %v783_v19 }
 0x36c   :  { %v790_v8 = vpop.f32.mrf.mxu0 }
 0x36d   :  { %v808_v39 = vmax.f32 %v783_v19, %v799_v30 }
 0x36e   :  { %v752_v6 = vpop.f32.mrf.mxu3 }
 0x36f   :  { %v753_v10 = vadd.f32 %v752_v6, %v658_v35  ;;  %v798_v35 = vmul.f32 0.01, %v781_v22  ;;  %v913_v6 = vld [vmem:[%s1553_s11] sm:$0x3] }
 0x371   :  { %v786_v17 = vadd.f32 %v785_v0, %v753_v10  ;;  %v807_v41 = vmax.f32 %v781_v22, %v798_v35 }
 0x373   :  { %v800_v23 = vmul.f32 0.01, %v786_v17  ;;  %v814_v42 = vpack.c.bf16 %v808_v39, %v807_v41 }
 0x374   :  { %v792_v61 = vpop.f32.mrf.mxu0 }
 0x376   :  { %v754_v9 = vpop.f32.mrf.mxu3 }
 0x377   :  { %v755_v51 = vadd.f32 %v754_v9, %v663_v37  ;;  %v809_v37 = vmax.f32 %v786_v17, %v800_v23 }
 0x379   :  { %v788_v14 = vadd.f32 %v787_v5, %v755_v51 }
 0x37b   :  { %v801_v20 = vmul.f32 0.01, %v788_v14 }
 0x37d   :  { %v810_v33 = vmax.f32 %v788_v14, %v801_v20 }
 0x37e   :  { %v757_v11 = vpop.f32.mrf.mxu3 }
 0x37f   :  { %v758_v12 = vadd.f32 %v757_v11, %v668_v47  ;;  %v815_v38 = vpack.c.bf16 %v810_v33, %v809_v37  ;;  %v864_v47 = vpack.c.b16 %v861_v46, %v861_v46 }
 0x381   :  { %v791_v15 = vadd.f32 %v790_v8, %v758_v12 }
 0x383   :  { %v802_v18 = vmul.f32 0.01, %v791_v15 }
 0x385   :  { %v811_v21 = vmax.f32 %v791_v15, %v802_v18 }
 0x386   :  { %v759_v24 = vpop.f32.mrf.mxu3 }
 0x387   :  { %v816_v26 = vpack.c.bf16 %v811_v21, %v811_v21 }
 0x389   :  { %v875_v34 = vsel %vm504_vm3, %v816_v26, 0 }
 0x38a   :  { %880 = vmatpush.bf16.msrb.mxu1 %v875_v34 }
 0x38e   :  { %881 = vmatpush.bf16.msrb.mxu1 %v815_v38 }
 0x392   :  { %882 = vmatpush.bf16.msrb.mxu1 %v814_v42 }
 0x396   :  { %883 = vmatpush.bf16.msrb.mxu1 %v813_v4 }
 0x39a   :  { %884 = vmatpush.bf16.msrb.mxu1 %v812_v55 }
 0x39d   :  { %1092 = vmatmul.msk.bf16.vlgmr.msrb.gmra.mxu1 %vm476_vm4, %v1120_v43 }
 0x3ad   :  { %1093 = vmatmul.msk.bf16.gmra.mxu1 %vm476_vm4, %v1121_v44 }
 0x3bd   :  { %1094 = vmatmul.msk.bf16.gmra.mxu1 %vm476_vm4, %v864_v47 }
 0x41a   :  { %v886_v48 = vpop.f32.mrf.mxu1 }
 0x41b   :  { %v887_v59 = vadd.f32 %v886_v48, %v830_v57 }
 0x41d   :  { %v900_v2 = vmul.f32 0.01, %v887_v59 }
 0x41f   :  { %v905_v7 = vmax.f32 %v887_v59, %v900_v2 }
 0x422   :  { %v888_v25 = vpop.f32.mrf.mxu1 }
 0x423   :  { %v889_v40 = vadd.f32 %v888_v25, %v835_v54 }
 0x425   :  { %v901_v62 = vmul.f32 0.01, %v889_v40 }
 0x427   :  { %v906_v4 = vmax.f32 %v889_v40, %v901_v62 }
 0x429   :  { %v910_v8 = vpack.c.bf16 %v906_v4, %v905_v7 }
 0x42a   :  { %v891_v28 = vpop.f32.mrf.mxu1 }
 0x42b   :  { %v892_v36 = vadd.f32 %v891_v28, %v840_v27 }
 0x42d   :  { %v902_v31 = vmul.f32 0.01, %v892_v36 }
 0x42f   :  { %v907_v3 = vmax.f32 %v892_v36, %v902_v31 }
 0x432   :  { %v893_v49 = vpop.f32.mrf.mxu1 }
 0x433   :  { %v894_v29 = vadd.f32 %v893_v49, %v845_v50 }
 0x435   :  { %v903_v56 = vmul.f32 0.01, %v894_v29 }
 0x437   :  { %v908_v63 = vmax.f32 %v894_v29, %v903_v56 }
 0x439   :  { %v911_v5 = vpack.c.bf16 %v908_v63, %v907_v3 }
 0x43a   :  { %v896_v52 = vpop.f32.mrf.mxu1 }
 0x43b   :  { %v897_v53 = vadd.f32 %v896_v52, %v850_v32 }
 0x43d   :  { %v904_v55 = vmul.f32 0.01, %v897_v53 }
 0x43f   :  { %v909_v58 = vmax.f32 %v897_v53, %v904_v55 }
 0x441   :  { %v912_v60 = vpack.c.bf16 %v909_v58, %v909_v58 }
 0x442   :  { %v898_v0 = vpop.f32.mrf.mxu1 }
 0x443   :  { %v918_v1 = vsel %vm245_vm1, %v912_v60, 0 }
 0x444   :  { %925 = vmatpush.bf16.msrb.mxu3 %v918_v1 }
 0x448   :  { %926 = vmatpush.bf16.msrb.mxu3 %v911_v5 }
 0x44c   :  { %927 = vmatpush.bf16.msrb.mxu3 %v910_v8 }
 0x44f   :  { %1095 = vmatmul.msk.bf16.vlgmr.msrb.gmra.mxu3 %vm229_vm2, %v913_v6 }
 0x4d2   :  { %v929_v61 = vpop.f32.mrf.mxu3 }
 0x4d3   :  { %v1096_v9 = vmul.f32 -1.442695, %v929_v61 }
 0x4d5   :  { %1127 = vpow2.f32 %v1096_v9 }
 0x4da   :  { %v931_v51 = vpop.f32.mrf.mxu3 }
 0x4db   :  { %v1128_v10 = vpop.eup %1127 }
 0x4dc   :  { %v936_v11 = vadd.f32 1.0, %v1128_v10 }
 0x4de   :  { %1129 = vrcp.f32 %v936_v11  ;;  %v948_v15 = vand.u32 2147483648, %v936_v11  ;;  %v946_v17 = vand.u32 2147483647, %v936_v11  ;;  %vm942_vm7 = vweird.f32 %v936_v11 }
 0x4e0   :  { %v949_v19 = vor.u32 1.1754944e-38, %v948_v15  ;;  %vm947_vm10 = vcmp.eq.f32.partialorder %v946_v17, 8.507059e+37 }
 0x4e4   :  { %v1130_v12 = vpop.eup %1129 }
 0x4e5   :  { %v938_v13 = vmul.f32 %v1130_v12, %v936_v11  ;;  %vm943_vm6 = vweird.f32 %v1130_v12 }
 0x4e6   :  { %vm944_vm8 = vmor %vm942_vm7, %vm943_vm6 }
 0x4e7   :  { %v939_v14 = vsub.f32 1.0, %v938_v13 }
 0x4e9   :  { %v940_v16 = vmul.f32 %v1130_v12, %v939_v14 }
 0x4eb   :  { %v941_v18 = vadd.f32 %v1130_v12, %v940_v16 }
 0x4ed   :  { %v945_v20 = vsel %vm944_vm8, %v1130_v12, %v941_v18 }
 0x4ee   :  { %v950_v21 = vsel %vm947_vm10, %v949_v19, %v945_v20 }
 0x4ef   :  { %953 = vst.msk [vmem:[#allocation2] sm:$0xf] %vm952_vm9, %v950_v21 }
 0x4f0   :  { %964 = dma.vmem_to_hbm [thread:$0]  %s960_s1, 64, %s962_s13, [#allocation3]  }
 0x4f1   :  { %1155 = dma.done.wait [#allocation3], 64  }
 0x4f2   :  { %1156 = vsyncadd [#allocation3], 4294967232 }
 0x4f3   :  { %969 = vsyncpa [#allocation3], 1 }

</bundles_post_ra>
